<compile_context>
chip_gen: v7x
topology: tpu7x:2x2x1
jax: 0.10.0
libtpu: 0.0.40
codegen_flags: <defaults>
</compile_context>

<pallas_src>
import jax
import jax.numpy as jnp
from jax.experimental import pallas as pl
from jax.experimental.pallas import tpu as pltpu


def _round_up(x, m):
    return ((x + m - 1) // m) * m


def highway_tts_kernel(x_ref, w0_ref, b0_ref, wht_ref, bht_ref, wf_ref, bf_ref,
                       o_ref):
    # x_ref:  (TN, Din) bf16          w0_ref: (Din, H) bf16    b0_ref: (1, H) f32
    # wht_ref:(L, H, 2H) bf16          bht_ref:(L, 1, 2H) f32
    # wf_ref: (H, H) bf16              bf_ref: (1, H) f32       o_ref: (TN, H) f32
    H = wf_ref.shape[0]
    num_hw = wht_ref.shape[0]

    x = x_ref[...]                                             # bf16 (TN, Din)

    # Leading Linear (affine, no activation); f32 accumulation.
    h = jnp.dot(x, w0_ref[...], preferred_element_type=jnp.float32) + b0_ref[...]

    # Highway stack (static unroll; fused Wh||Wt matmul per layer -> 128 lanes).
    for l in range(num_hw):
        pre = jnp.dot(h.astype(jnp.bfloat16), wht_ref[l],
                      preferred_element_type=jnp.float32) + bht_ref[l]
        h_act = jnp.maximum(pre[:, :H], 0.0)                   # ReLU branch (f32)
        t_gate = jax.nn.sigmoid(pre[:, H:])                    # gate (f32, EUP)
        h = h + t_gate * (h_act - h)                           # highway blend

    # Final nn.Linear(hidden, hidden).
    out = jnp.dot(h.astype(jnp.bfloat16), wf_ref[...],
                  preferred_element_type=jnp.float32) + bf_ref[...]
    # TODO(synk): output last dim (H=64) < 128 lanes -> masked vst; a lane-dense
    # (TN//2, 128) repack was considered but skipped since the store is not the
    # bottleneck at this compute-heavy ratio.
    o_ref[...] = out.astype(o_ref.dtype)


def init_params(key, input_dim, mel_dim, num_layers, ratio, dtype=jnp.float32):
    hidden = mel_dim * ratio
    n_hw = num_layers - 1
    ks = jax.random.split(key, 5)
    scale_in = 1.0 / jnp.sqrt(jnp.asarray(input_dim, dtype))
    scale_h = 1.0 / jnp.sqrt(jnp.asarray(hidden, dtype))
    params = {
        # weights stored (in, out) so the kernel does x @ W + b
        "w0": jax.random.normal(ks[0], (input_dim, hidden), dtype) * scale_in,
        "b0": jnp.zeros((1, hidden), dtype),
        "wh": jax.random.normal(ks[1], (n_hw, hidden, hidden), dtype) * scale_h,
        "bh": jnp.zeros((n_hw, 1, hidden), dtype),               # Highway H bias -> 0
        "wt": jax.random.normal(ks[2], (n_hw, hidden, hidden), dtype) * scale_h,
        "bt": jnp.full((n_hw, 1, hidden), -1.0, dtype),          # Highway T bias -> -1
        "wf": jax.random.normal(ks[3], (hidden, hidden), dtype) * scale_h,
        "bf": jax.random.normal(ks[4], (1, hidden), dtype) * scale_h,
    }
    return params


def highway_tts_forward(inputs, input_lengths, teacher, params, ratio,
                        tf_rate=0.0, tile_rows=512):
    # inputs: (B, S, input_dim) feature-last
    B, S, Din = inputs.shape
    hidden = params["w0"].shape[1]
    n_hw = params["wh"].shape[0]
    N = B * S

    # Row tile: as large as is useful (>=256 ideally), multiple of 8, padded.
    TN = max(8, min(tile_rows, _round_up(N, 8)))
    N_pad = _round_up(N, TN)

    x2 = inputs.reshape(N, Din)
    if N_pad != N:
        x2 = jnp.pad(x2, ((0, N_pad - N), (0, 0)))
    x2 = x2.astype(jnp.bfloat16)

    # Pack + cast weights: bf16 MXU operands, f32 biases (elementwise stays f32).
    w0 = params["w0"].astype(jnp.bfloat16)
    b0 = params["b0"].astype(jnp.float32)
    wht = jnp.concatenate([params["wh"], params["wt"]], axis=-1).astype(jnp.bfloat16)
    bht = jnp.concatenate([params["bh"], params["bt"]], axis=-1).astype(jnp.float32)
    wf = params["wf"].astype(jnp.bfloat16)
    bf = params["bf"].astype(jnp.float32)

    grid = (N_pad // TN,)

    weight_bytes = (w0.size + wht.size + wf.size) * 2 + (b0.size + bht.size + bf.size) * 4
    cost = pl.CostEstimate(
        flops=2 * N_pad * (Din * hidden + n_hw * hidden * 2 * hidden + hidden * hidden),
        transcendentals=N_pad * n_hw * hidden,
        bytes_accessed=x2.size * 2 + N_pad * hidden * 4 + weight_bytes,
    )

    out2 = pl.pallas_call(
        highway_tts_kernel,
        out_shape=jax.ShapeDtypeStruct((N_pad, hidden), jnp.float32),
        grid=grid,
        in_specs=[
            pl.BlockSpec((TN, Din), lambda i: (i, 0)),                     # x tile
            pl.BlockSpec((Din, hidden), lambda i: (0, 0)),                 # w0 (resident)
            pl.BlockSpec((1, hidden), lambda i: (0, 0)),                   # b0
            pl.BlockSpec((n_hw, hidden, 2 * hidden), lambda i: (0, 0, 0)),  # Wh||Wt
            pl.BlockSpec((n_hw, 1, 2 * hidden), lambda i: (0, 0, 0)),       # bh||bt
            pl.BlockSpec((hidden, hidden), lambda i: (0, 0)),              # wf
            pl.BlockSpec((1, hidden), lambda i: (0, 0)),                   # bf
        ],
        out_specs=pl.BlockSpec((TN, hidden), lambda i: (i, 0)),
        compiler_params=pltpu.CompilerParams(
            dimension_semantics=("parallel",)),
        cost_estimate=cost,
    )(x2, w0, b0, wht, bht, wf, bf)

    out2 = out2[:N]
    # outputs.reshape(-1, S*ratio, hidden//ratio)
    outputs = out2.reshape(B, S * ratio, hidden // ratio)
    # TODO(synk): `outputs.unsqueeze(1)` in the PyTorch code is not in-place and
    # has no effect on the returned value, so it is intentionally omitted.
    return outputs, None, None


def reference_forward(inputs, params, ratio):
    # Pure-JAX reference emulating the kernel's numerics (bf16 MXU inputs,
    # f32 accumulation, f32 elementwise).
    B, S, Din = inputs.shape
    hidden = params["w0"].shape[1]
    bf16 = jnp.bfloat16
    h = jnp.dot(inputs.reshape(B * S, Din).astype(bf16), params["w0"].astype(bf16),
                preferred_element_type=jnp.float32) + params["b0"]
    wht = jnp.concatenate([params["wh"], params["wt"]], axis=-1).astype(bf16)
    bht = jnp.concatenate([params["bh"], params["bt"]], axis=-1)
    for l in range(params["wh"].shape[0]):
        pre = jnp.dot(h.astype(bf16), wht[l], preferred_element_type=jnp.float32) + bht[l]
        h_act = jnp.maximum(pre[:, :hidden], 0.0)
        t_gate = jax.nn.sigmoid(pre[:, hidden:])
        h = h + t_gate * (h_act - h)
    out = jnp.dot(h.astype(bf16), params["wf"].astype(bf16),
                  preferred_element_type=jnp.float32) + params["bf"]
    return out.reshape(B, S * ratio, hidden // ratio)


if __name__ == "__main__":
    # Small shapes: batch=2, seq=8, input_dim=32, mel_dim=16, ratio=4 -> hidden=64
    B, S = 2, 8
    input_dim, mel_dim, num_layers, ratio = 32, 16, 3, 4

    key = jax.random.PRNGKey(0)
    k_x, k_p = jax.random.split(key)
    x = jax.random.normal(k_x, (B, S, input_dim), jnp.float32)
    input_lengths = jnp.full((B,), S, jnp.int32)   # unused by forward
    teacher = None                                  # unused by forward
    params = init_params(k_p, input_dim, mel_dim, num_layers, ratio)

    outputs, _, _ = highway_tts_forward(x, input_lengths, teacher, params, ratio)
    outputs = jax.block_until_ready(outputs)

    ref = reference_forward(x, params, ratio)
    assert outputs.shape == (B, S * ratio, mel_dim), outputs.shape
    assert jnp.allclose(outputs, ref, atol=2e-3, rtol=2e-3), (
        float(jnp.max(jnp.abs(outputs - ref))))
    print("KERNEL_OK")
</pallas_src>

<mosaic_0001>
module attributes {stable_mosaic.version = 11 : i64} {
  func.func @highway_tts_kernel(%arg0: i32, %arg1: memref<16x32xbf16, #tpu.memory_space<vmem>>, %arg2: memref<32x64xbf16, #tpu.memory_space<vmem>>, %arg3: memref<1x64xf32, #tpu.memory_space<vmem>>, %arg4: memref<2x64x128xbf16, #tpu.memory_space<vmem>>, %arg5: memref<2x1x128xf32, #tpu.memory_space<vmem>>, %arg6: memref<64x64xbf16, #tpu.memory_space<vmem>>, %arg7: memref<1x64xf32, #tpu.memory_space<vmem>>, %arg8: memref<16x64xf32, #tpu.memory_space<vmem>>) attributes {dimension_semantics = [#tpu.dimension_semantics<parallel>], iteration_bounds = array<i64: 1>, scalar_prefetch = 0 : i64, scratch_operands = 0 : i64, tpu.core_type = #tpu.core_type<tc>, window_params = [{transform_indices = @transform_0, window_bounds = array<i64: 16, 32>}, {pipeline_mode = #tpu.pipeline_mode<synchronous>, transform_indices = @transform_1, window_bounds = array<i64: 32, 64>}, {pipeline_mode = #tpu.pipeline_mode<synchronous>, transform_indices = @transform_2, window_bounds = array<i64: 1, 64>}, {pipeline_mode = #tpu.pipeline_mode<synchronous>, transform_indices = @transform_3, window_bounds = array<i64: 2, 64, 128>}, {pipeline_mode = #tpu.pipeline_mode<synchronous>, transform_indices = @transform_4, window_bounds = array<i64: 2, 1, 128>}, {pipeline_mode = #tpu.pipeline_mode<synchronous>, transform_indices = @transform_5, window_bounds = array<i64: 64, 64>}, {pipeline_mode = #tpu.pipeline_mode<synchronous>, transform_indices = @transform_6, window_bounds = array<i64: 1, 64>}, {transform_indices = @transform_7, window_bounds = array<i64: 16, 64>}]} {
    %c0 = arith.constant 0 : index
    %c0_0 = arith.constant 0 : index
    %0 = vector.load %arg1[%c0, %c0_0] : memref<16x32xbf16, #tpu.memory_space<vmem>>, vector<16x32xbf16>
    %c0_1 = arith.constant 0 : index
    %c0_2 = arith.constant 0 : index
    %1 = vector.load %arg2[%c0_1, %c0_2] : memref<32x64xbf16, #tpu.memory_space<vmem>>, vector<32x64xbf16>
    %cst = arith.constant dense<0.000000e+00> : vector<16x64xf32>
    %2 = tpu.matmul %0, %1, %cst {dimension_numbers = #tpu.dot_dimension_numbers<[1], [0], [0], [1], [0, 0, 1, 1], [], []>} : vector<16x32xbf16>, vector<32x64xbf16>, vector<16x64xf32> -> vector<16x64xf32>
    %c0_3 = arith.constant 0 : index
    %c0_4 = arith.constant 0 : index
    %3 = vector.load %arg3[%c0_3, %c0_4] : memref<1x64xf32, #tpu.memory_space<vmem>>, vector<1x64xf32>
    %4 = vector.broadcast %3 : vector<1x64xf32> to vector<16x64xf32>
    %5 = arith.addf %2, %4 : vector<16x64xf32>
    %6 = arith.truncf %5 : vector<16x64xf32> to vector<16x64xbf16>
    %c0_5 = arith.constant 0 : index
    %c0_6 = arith.constant 0 : index
    %c0_7 = arith.constant 0 : index
    %7 = vector.load %arg4[%c0_5, %c0_6, %c0_7] : memref<2x64x128xbf16, #tpu.memory_space<vmem>>, vector<1x64x128xbf16>
    %8 = vector.shape_cast %7 : vector<1x64x128xbf16> to vector<64x128xbf16>
    %cst_8 = arith.constant dense<0.000000e+00> : vector<16x128xf32>
    %9 = tpu.matmul %6, %8, %cst_8 {dimension_numbers = #tpu.dot_dimension_numbers<[1], [0], [0], [1], [0, 0, 1, 1], [], []>} : vector<16x64xbf16>, vector<64x128xbf16>, vector<16x128xf32> -> vector<16x128xf32>
    %c0_9 = arith.constant 0 : index
    %c0_10 = arith.constant 0 : index
    %c0_11 = arith.constant 0 : index
    %10 = vector.load %arg5[%c0_9, %c0_10, %c0_11] : memref<2x1x128xf32, #tpu.memory_space<vmem>>, vector<1x1x128xf32>
    %11 = vector.shape_cast %10 : vector<1x1x128xf32> to vector<1x128xf32>
    %12 = vector.broadcast %11 : vector<1x128xf32> to vector<16x128xf32>
    %13 = arith.addf %9, %12 : vector<16x128xf32>
    %14 = vector.extract_strided_slice %13 {offsets = [0, 0], sizes = [16, 64], strides = [1, 1]} : vector<16x128xf32> to vector<16x64xf32>
    %cst_12 = arith.constant 0.000000e+00 : f32
    %15 = vector.broadcast %cst_12 : f32 to vector<16x64xf32>
    %16 = arith.maximumf %14, %15 : vector<16x64xf32>
    %17 = vector.extract_strided_slice %13 {offsets = [0, 64], sizes = [16, 64], strides = [1, 1]} : vector<16x128xf32> to vector<16x64xf32>
    %18 = arith.negf %17 : vector<16x64xf32>
    %19 = math.exp %18 : vector<16x64xf32>
    %cst_13 = arith.constant 1.000000e+00 : f32
    %20 = vector.broadcast %cst_13 : f32 to vector<16x64xf32>
    %21 = arith.addf %20, %19 : vector<16x64xf32>
    %22 = arith.divf %20, %21 : vector<16x64xf32>
    %23 = arith.subf %16, %5 : vector<16x64xf32>
    %24 = arith.mulf %22, %23 : vector<16x64xf32>
    %25 = arith.addf %5, %24 : vector<16x64xf32>
    %26 = arith.truncf %25 : vector<16x64xf32> to vector<16x64xbf16>
    %c1 = arith.constant 1 : index
    %c0_14 = arith.constant 0 : index
    %c0_15 = arith.constant 0 : index
    %27 = vector.load %arg4[%c1, %c0_14, %c0_15] : memref<2x64x128xbf16, #tpu.memory_space<vmem>>, vector<1x64x128xbf16>
    %28 = vector.shape_cast %27 : vector<1x64x128xbf16> to vector<64x128xbf16>
    %cst_16 = arith.constant dense<0.000000e+00> : vector<16x128xf32>
    %29 = tpu.matmul %26, %28, %cst_16 {dimension_numbers = #tpu.dot_dimension_numbers<[1], [0], [0], [1], [0, 0, 1, 1], [], []>} : vector<16x64xbf16>, vector<64x128xbf16>, vector<16x128xf32> -> vector<16x128xf32>
    %c1_17 = arith.constant 1 : index
    %c0_18 = arith.constant 0 : index
    %c0_19 = arith.constant 0 : index
    %30 = vector.load %arg5[%c1_17, %c0_18, %c0_19] : memref<2x1x128xf32, #tpu.memory_space<vmem>>, vector<1x1x128xf32>
    %31 = vector.shape_cast %30 : vector<1x1x128xf32> to vector<1x128xf32>
    %32 = vector.broadcast %31 : vector<1x128xf32> to vector<16x128xf32>
    %33 = arith.addf %29, %32 : vector<16x128xf32>
    %34 = vector.extract_strided_slice %33 {offsets = [0, 0], sizes = [16, 64], strides = [1, 1]} : vector<16x128xf32> to vector<16x64xf32>
    %cst_20 = arith.constant 0.000000e+00 : f32
    %35 = vector.broadcast %cst_20 : f32 to vector<16x64xf32>
    %36 = arith.maximumf %34, %35 : vector<16x64xf32>
    %37 = vector.extract_strided_slice %33 {offsets = [0, 64], sizes = [16, 64], strides = [1, 1]} : vector<16x128xf32> to vector<16x64xf32>
    %38 = arith.negf %37 : vector<16x64xf32>
    %39 = math.exp %38 : vector<16x64xf32>
    %cst_21 = arith.constant 1.000000e+00 : f32
    %40 = vector.broadcast %cst_21 : f32 to vector<16x64xf32>
    %41 = arith.addf %40, %39 : vector<16x64xf32>
    %42 = arith.divf %40, %41 : vector<16x64xf32>
    %43 = arith.subf %36, %25 : vector<16x64xf32>
    %44 = arith.mulf %42, %43 : vector<16x64xf32>
    %45 = arith.addf %25, %44 : vector<16x64xf32>
    %46 = arith.truncf %45 : vector<16x64xf32> to vector<16x64xbf16>
    %c0_22 = arith.constant 0 : index
    %c0_23 = arith.constant 0 : index
    %47 = vector.load %arg6[%c0_22, %c0_23] : memref<64x64xbf16, #tpu.memory_space<vmem>>, vector<64x64xbf16>
    %cst_24 = arith.constant dense<0.000000e+00> : vector<16x64xf32>
    %48 = tpu.matmul %46, %47, %cst_24 {dimension_numbers = #tpu.dot_dimension_numbers<[1], [0], [0], [1], [0, 0, 1, 1], [], []>} : vector<16x64xbf16>, vector<64x64xbf16>, vector<16x64xf32> -> vector<16x64xf32>
    %c0_25 = arith.constant 0 : index
    %c0_26 = arith.constant 0 : index
    %49 = vector.load %arg7[%c0_25, %c0_26] : memref<1x64xf32, #tpu.memory_space<vmem>>, vector<1x64xf32>
    %50 = vector.broadcast %49 : vector<1x64xf32> to vector<16x64xf32>
    %51 = arith.addf %48, %50 : vector<16x64xf32>
    %c0_27 = arith.constant 0 : index
    %c0_28 = arith.constant 0 : index
    %52 = vector.load %arg8[%c0_27, %c0_28] : memref<16x64xf32, #tpu.memory_space<vmem>>, vector<16x64xf32>
    tpu.vector_store %arg8[%c0_27, %c0_28], %51 {strides = array<i32>} : memref<16x64xf32, #tpu.memory_space<vmem>>, vector<16x64xf32>,
    return
  }
  func.func @transform_0(%arg0: i32) -> (i32, i32) {
    %c0_i32 = arith.constant 0 : i32
    %c0_i32_0 = arith.constant 0 : i32
    return %arg0, %c0_i32 : i32, i32
  }
  func.func @transform_1(%arg0: i32) -> (i32, i32) {
    %c0_i32 = arith.constant 0 : i32
    %c0_i32_0 = arith.constant 0 : i32
    %c0_i32_1 = arith.constant 0 : i32
    return %c0_i32, %c0_i32_0 : i32, i32
  }
  func.func @transform_2(%arg0: i32) -> (i32, i32) {
    %c0_i32 = arith.constant 0 : i32
    %c0_i32_0 = arith.constant 0 : i32
    %c0_i32_1 = arith.constant 0 : i32
    return %c0_i32, %c0_i32_0 : i32, i32
  }
  func.func @transform_3(%arg0: i32) -> (i32, i32, i32) {
    %c0_i32 = arith.constant 0 : i32
    %c0_i32_0 = arith.constant 0 : i32
    %c0_i32_1 = arith.constant 0 : i32
    %c0_i32_2 = arith.constant 0 : i32
    return %c0_i32, %c0_i32_0, %c0_i32_1 : i32, i32, i32
  }
  func.func @transform_4(%arg0: i32) -> (i32, i32, i32) {
    %c0_i32 = arith.constant 0 : i32
    %c0_i32_0 = arith.constant 0 : i32
    %c0_i32_1 = arith.constant 0 : i32
    %c0_i32_2 = arith.constant 0 : i32
    return %c0_i32, %c0_i32_0, %c0_i32_1 : i32, i32, i32
  }
  func.func @transform_5(%arg0: i32) -> (i32, i32) {
    %c0_i32 = arith.constant 0 : i32
    %c0_i32_0 = arith.constant 0 : i32
    %c0_i32_1 = arith.constant 0 : i32
    return %c0_i32, %c0_i32_0 : i32, i32
  }
  func.func @transform_6(%arg0: i32) -> (i32, i32) {
    %c0_i32 = arith.constant 0 : i32
    %c0_i32_0 = arith.constant 0 : i32
    %c0_i32_1 = arith.constant 0 : i32
    return %c0_i32, %c0_i32_0 : i32, i32
  }
  func.func @transform_7(%arg0: i32) -> (i32, i32) {
    %c0_i32 = arith.constant 0 : i32
    %c0_i32_0 = arith.constant 0 : i32
    return %arg0, %c0_i32 : i32, i32
  }
}

</mosaic_0001>

<bundles_post_ra>
// kernel: tpu_custom_call.1
= control target key start
LH: loop header
LB: loop body
LE: loop exit
PB: predicated region body
PF: predicated region fallthrough
CT: control target
= control target key end

     0   :  { %12 = vsyncpa [#allocation3], 0  ;;  %s940_s0 = inlined_call_operand.hbm [shape: bf16[16,32], index: 0, kind: input, shape index: {}]   ;;  %s941_s1 = inlined_call_operand.hbm [shape: bf16[32,64], index: 1, kind: input, shape index: {}]   ;;  %s942_s2 = inlined_call_operand.vmem [shape: f32[1,64], index: 2, kind: input, shape index: {}]   ;;  %s943_s3 = inlined_call_operand.hbm [shape: bf16[2,64,128], index: 3, kind: input, shape index: {}]   ;;  %s944_s4 = inlined_call_operand.vmem [shape: f32[2,1,128], index: 4, kind: input, shape index: {}]   ;;  %s945_s5 = inlined_call_operand.hbm [shape: bf16[64,64], index: 5, kind: input, shape index: {}]   ;;  %s946_s6 = inlined_call_operand.vmem [shape: f32[1,64], index: 6, kind: input, shape index: {}]   ;;  %s947_s7 = inlined_call_operand.hbm [shape: f32[16,64], index: 7, kind: output, shape index: {}]  }
   0x1   :  { %13 = vsyncpa [#allocation6], 0 }
   0x2   :  { %14 = vsyncpa [#allocation9], 0 }
   0x3   :  { %15 = vsyncpa [#allocation4], 0  ;;  %s756_s24 = smov [#allocation5]   ;;  %s757_s26 = smov [#allocation2]  }
   0x4   :  { %s33_s25 = sshll.u32 %s756_s24, 4  ;;  %s21_s27 = sshll.u32 %s757_s26, 4  ;;  %s34_s25 = int_to_ptr.vmem [resolvable:$true] %s33_s25  ;;  %s807_s27 = int_to_ptr.vmem [resolvable:$true] %s21_s27 }
   0x5   :  { %s638_s30 = scalar_lea.hbm %s941_s1, 256 }
   0x6   :  { %p639_p0 = scmp.ne.s32.totalorder %s941_s1, %s638_s30  ;;  %p642_p1 = scmp.lt.u32.totalorder %s638_s30, %s941_s1 }
   0x8   :  { %p644_p2 = pnand %p642_p1, %p639_p0 }
   0xa   :  { %647 = shalt.err (!%p644_p2)
}
   0xb   :  { %s648_s12 = scalar_lea.vmem %s34_s25, 256  ;;  %p653_p4 = scmp.lt.s32.totalorder %s34_s25, %s34_s25 }
   0xc   :  { %p649_p3 = scmp.ne.s32.totalorder %s34_s25, %s648_s12  ;;  %p654_p5 = scmp.lt.s32.totalorder %s648_s12, %s648_s12 }
   0xe   :  { %p655_p6 = por %p654_p5, %p653_p4 }
  0x10   :  { %p656_p7 = pnand %p655_p6, %p649_p3 }
  0x12   :  { %659 = shalt.err (!%p656_p7)
}
  0x13   :  { %s758_s13 = smov 64   ;;  %s759_s14 = smov 4  }
  0x14   :  { %39 = dma.hbm_to_vmem [thread:$0]  %s941_s1, 256, %s34_s25, [#allocation6], %s758_s13, %s758_s13, %s759_s14  }
  0x15   :  { %s660_s19 = scalar_lea.hbm %s940_s0, 128 }
  0x16   :  { %p661_p8 = scmp.ne.s32.totalorder %s940_s0, %s660_s19  ;;  %p664_p9 = scmp.lt.u32.totalorder %s660_s19, %s940_s0 }
  0x18   :  { %p666_p10 = pnand %p664_p9, %p661_p8 }
  0x1a   :  { %669 = shalt.err (!%p666_p10)
}
  0x1b   :  { %s670_s24 = scalar_lea.vmem %s807_s27, 128  ;;  %p675_p12 = scmp.lt.s32.totalorder %s807_s27, %s807_s27 }
  0x1c   :  { %p671_p11 = scmp.ne.s32.totalorder %s807_s27, %s670_s24  ;;  %p676_p13 = scmp.lt.s32.totalorder %s670_s24, %s670_s24 }
  0x1e   :  { %p677_p0 = por %p676_p13, %p675_p12 }
  0x20   :  { %p678_p1 = pnand %p677_p0, %p671_p11 }
  0x22   :  { %681 = shalt.err (!%p678_p1)
}
  0x23   :  { %27 = dma.hbm_to_vmem [thread:$0]  %s940_s0, 128, %s807_s27, [#allocation3], %s758_s13, %s758_s13, %s759_s14  }
  0x24   :  { %s760_s26 = smov [#allocation7]   ;;  %s761_s29 = smov [#allocation8]  }
  0x25   :  { %s47_s28 = sshll.u32 %s760_s26, 4  ;;  %s61_s30 = sshll.u32 %s761_s29, 4  ;;  %s48_s28 = int_to_ptr.vmem [resolvable:$true] %s47_s28  ;;  %s844_s30 = int_to_ptr.vmem [resolvable:$true] %s61_s30 }
  0x26   :  { %s682_s10 = scalar_lea.hbm %s943_s3, 1024 }
  0x27   :  { %p683_p2 = scmp.ne.s32.totalorder %s943_s3, %s682_s10  ;;  %p686_p3 = scmp.lt.u32.totalorder %s682_s10, %s943_s3 }
  0x29   :  { %p688_p4 = pnand %p686_p3, %p683_p2 }
  0x2b   :  { %691 = shalt.err (!%p688_p4)
}
  0x2c   :  { %s692_s0 = scalar_lea.vmem %s48_s28, 1024  ;;  %p697_p6 = scmp.lt.s32.totalorder %s48_s28, %s48_s28 }
  0x2d   :  { %p693_p5 = scmp.ne.s32.totalorder %s48_s28, %s692_s0  ;;  %p698_p7 = scmp.lt.s32.totalorder %s692_s0, %s692_s0 }
  0x2f   :  { %p699_p8 = por %p698_p7, %p697_p6 }
  0x31   :  { %p700_p9 = pnand %p699_p8, %p693_p5 }
  0x33   :  { %703 = shalt.err (!%p700_p9)
}
  0x34   :  { %53 = dma.hbm_to_vmem [thread:$0]  %s943_s3, 1024, %s48_s28, [#allocation6], %s758_s13, %s758_s13, %s759_s14  }
  0x35   :  { %s704_s20 = scalar_lea.hbm %s945_s5, 512 }
  0x36   :  { %p705_p10 = scmp.ne.s32.totalorder %s945_s5, %s704_s20  ;;  %p708_p11 = scmp.lt.u32.totalorder %s704_s20, %s945_s5 }
  0x38   :  { %p710_p12 = pnand %p708_p11, %p705_p10 }
  0x3a   :  { %713 = shalt.err (!%p710_p12)
}
  0x3b   :  { %s714_s1 = scalar_lea.vmem %s844_s30, 512  ;;  %p719_p0 = scmp.lt.s32.totalorder %s844_s30, %s844_s30 }
  0x3c   :  { %p715_p13 = scmp.ne.s32.totalorder %s844_s30, %s714_s1  ;;  %p720_p1 = scmp.lt.s32.totalorder %s714_s1, %s714_s1 }
  0x3e   :  { %p721_p2 = por %p720_p1, %p719_p0 }
  0x40   :  { %p722_p3 = pnand %p721_p2, %p715_p13 }
  0x42   :  { %725 = shalt.err (!%p722_p3)
}
  0x43   :  { %67 = dma.hbm_to_vmem [thread:$0]  %s945_s5, 512, %s844_s30, [#allocation9], %s758_s13, %s758_s13, %s759_s14  }
  0x44   :  { %748 = dma.done.wait [#allocation3], 128  }
  0x45   :  { %749 = vsyncadd [#allocation3], 4294967168 }
  0x46   :  { %750 = dma.done.wait [#allocation6], 1280  }
  0x47   :  { %751 = vsyncadd [#allocation6], 4294966016 }
  0x48   :  { %752 = dma.done.wait [#allocation9], 512  }
  0x49   :  { %753 = vsyncadd [#allocation9], 4294966784  ;;  %v762_v0 = vmov 0.0   ;;  %vm763_vm0 = vmmov 0   ;;  %v607_v1 = vld [vmem:[#allocation5] sm:$0xff]   ;;  %v608_v2 = vld [vmem:[#allocation5 + $0x8] sm:$0xff]  }
  0x4a   :  { %552 = vmatprep.subr.bf16.mxu0 %v762_v0  ;;  %556 = vmatprep.mubr.msk.bf16.mxu0 %vm763_vm0, %v762_v0  ;;  %v610_v3 = vld [vmem:[#allocation7] sm:$0xff]   ;;  %v609_v4 = vld [vmem:[#allocation2] sm:$0xff]   ;;  %vm113_vm1 = vcmask 261120   ;;  %v612_v6 = vld [vmem:[#allocation7 + $0x10] sm:$0xff]   ;;  %vm198_vm2 = vcmask 523264   ;;  %s764_s8 = smov [#allocation10]  }
  0x4b   :  { %560 = vmatprep.subr.bf16.mxu1 %v762_v0  ;;  %568 = vmatprep.mubr.msk.bf16.mxu1 %vm763_vm0, %v762_v0  ;;  %v611_v5 = vld [vmem:[#allocation7 + $0x8] sm:$0xff]   ;;  %v613_v7 = vld [vmem:[#allocation7 + $0x18] sm:$0xff]   ;;  %v614_v18 = vld [vmem:[#allocation7 + $0x20] sm:$0xff]   ;;  %s492_s9 = sshll.u32 %s764_s8, 4  ;;  %s493_s9 = int_to_ptr.vmem [resolvable:$true] %s492_s9 }
  0x4c   :  { %553 = vmatpush3.bf16.msra.mxu0 %v607_v1  ;;  %561 = vmatpush3.bf16.msra.mxu1 %v610_v3  ;;  %v506_v8 = vld [vmem:[%s942_s2] ss:$0 sm:$0xff]  ;;  %v616_v34 = vld [vmem:[#allocation7 + $0x30] sm:$0xff]   ;;  %v617_v36 = vld [vmem:[#allocation7 + $0x38] sm:$0xff]   ;;  %p731_p5 = scmp.lt.s32.totalorder %s493_s9, %s493_s9 }
  0x4d   :  { %554 = vmatprep.subr.bf16.mxu0 %v762_v0  ;;  %562 = vmatprep.subr.bf16.mxu1 %v762_v0  ;;  %v511_v16 = vld [vmem:[%s944_s4] ss:$0 sm:$0xff]  ;;  %v520_v48 = vld [vmem:[%s944_s4 + $0x1] ss:$0 sm:$0xff]  ;;  %v618_v49 = vld [vmem:[#allocation8] sm:$0xff]  }
  0x4e   :  { %v615_v22 = vld [vmem:[#allocation7 + $0x28] sm:$0xff]   ;;  %v620_v58 = vld [vmem:[#allocation8 + $0x10] sm:$0xff]  }
  0x4f   :  { %v619_v51 = vld [vmem:[#allocation8 + $0x8] sm:$0xff]  }
  0x50   :  { %555 = vmatpush3.bf16.msra.mxu0 %v608_v2  ;;  %563 = vmatpush3.bf16.msra.mxu1 %v611_v5  ;;  %v621_v5 = vld [vmem:[#allocation8 + $0x18] sm:$0xff]  }
  0x51   :  { %572 = vmatprep.subr.bf16.mxu0 %v762_v0  ;;  %564 = vmatprep.subr.bf16.mxu1 %v762_v0 }
  0x53   :  { %557 = vmatmul.mubr.msk.bf16.vlgmr.msra.gmra.mrb[0].mxu0 %vm113_vm1, %v609_v4 }
  0x54   :  { %580 = vmatprep.mubr.msk.bf16.mxu0 %vm763_vm0, %v762_v0  ;;  %565 = vmatpush3.bf16.msra.mxu1 %v612_v6 }
  0x55   :  { %566 = vmatprep.subr.bf16.mxu1 %v762_v0  ;;  %573 = vmatpush3.bf16.msra.mxu0 %v614_v18 }
  0x56   :  { %574 = vmatprep.subr.bf16.mxu0 %v762_v0 }
  0x58   :  { %567 = vmatpush3.bf16.msra.mxu1 %v613_v7 }
  0x59   :  { %584 = vmatprep.subr.bf16.mxu1 %v762_v0  ;;  %575 = vmatpush3.bf16.msra.mxu0 %v615_v22 }
  0x5a   :  { %576 = vmatprep.subr.bf16.mxu0 %v762_v0 }
  0x5d   :  { %577 = vmatpush3.bf16.msra.mxu0 %v616_v34 }
  0x5e   :  { %578 = vmatprep.subr.bf16.mxu0 %v762_v0 }
  0x61   :  { %579 = vmatpush3.bf16.msra.mxu0 %v617_v36 }
 0x126   :  { %v151_v9 = vpop.f32.mrb[0].mxu0 }
 0x127   :  { %v558_v10 = vpop.f32.mrb[1].mxu0  ;;  %v152_v12 = vadd.f32 %v506_v8, %v151_v9 }
 0x128   :  { %v154_v11 = vpop.f32.mrb[2].mxu0 }
 0x129   :  { %v155_v13 = vadd.f32 %v506_v8, %v154_v11  ;;  %v559_v14 = vpop.f32.mrb[3].mxu0 }
 0x12b   :  { %v158_v15 = vpack.c.bf16 %v155_v13, %v152_v12 }
 0x12d   :  { %569 = vmatmul.mubr.msk.bf16.vlgmr.msra.gmra.mrb[0].mxu1 %vm198_vm2, %v158_v15 }
 0x12e   :  { %592 = vmatprep.mubr.msk.bf16.mxu1 %vm763_vm0, %v762_v0  ;;  %585 = vmatpush3.bf16.msra.mxu1 %v618_v49 }
 0x12f   :  { %586 = vmatprep.subr.bf16.mxu1 %v762_v0 }
 0x132   :  { %587 = vmatpush3.bf16.msra.mxu1 %v619_v51 }
 0x133   :  { %588 = vmatprep.subr.bf16.mxu1 %v762_v0 }
 0x136   :  { %589 = vmatpush3.bf16.msra.mxu1 %v620_v58 }
 0x137   :  { %590 = vmatprep.subr.bf16.mxu1 %v762_v0 }
 0x13a   :  { %591 = vmatpush3.bf16.msra.mxu1 %v621_v5 }
 0x200   :  { %v236_v17 = vpop.f32.mrb[0].mxu1 }
 0x201   :  { %v237_v19 = vadd.f32 %v511_v16, %v236_v17  ;;  %v570_v20 = vpop.f32.mrb[1].mxu1 }
 0x202   :  { %v239_v21 = vpop.f32.mrb[2].mxu1 }
 0x203   :  { %v240_v23 = vadd.f32 %v511_v16, %v239_v21  ;;  %v571_v24 = vpop.f32.mrb[3].mxu1  ;;  %v243_v25 = vmax.f32 %v237_v19, 0.0  ;;  %v517_v29 = vmul.f32 -1.442695, %v237_v19  ;;  %v528_v16 = vld [vmem:[%s946_s6] ss:$0 sm:$0xff] }
 0x205   :  { %v244_v26 = vmax.f32 %v240_v23, 0.0  ;;  %v257_v27 = vsub.f32 %v243_v25, %v152_v12  ;;  %622 = vpow2.f32 %v517_v29  ;;  %v518_v30 = vmul.f32 -1.442695, %v240_v23 }
 0x207   :  { %261 = vrot.lane.b32.xlu0 %v257_v27, %s758_s13  ;;  %v258_v28 = vsub.f32 %v244_v26, %v155_v13  ;;  %624 = vpow2.f32 %v518_v30 }
 0x20b   :  { %263 = vrot.lane.b32.xlu0 %v258_v28, %s758_s13 }
 0x20f   :  { %v623_v31 = vpop.eup %622 }
 0x210   :  { %v251_v32 = vadd.f32 1.0, %v623_v31 }
 0x211   :  { %v625_v33 = vpop.eup %624 }
 0x212   :  { %626 = vrcp.f32 %v251_v32  ;;  %v252_v35 = vadd.f32 1.0, %v625_v33 }
 0x214   :  { %628 = vrcp.f32 %v252_v35 }
 0x21c   :  { %v627_v37 = vpop.eup %626 }
 0x21e   :  { %v629_v40 = vpop.eup %628 }
 0x279   :  { %v262_v38 = vpop.permute.xlu0 %261 }
 0x27a   :  { %v267_v39 = vmul.f32 %v627_v37, %v262_v38 }
 0x27c   :  { %271 = vrot.lane.b32.xlu1 %v267_v39, %s758_s13 }
 0x27d   :  { %v264_v41 = vpop.permute.xlu0 %263 }
 0x27e   :  { %v268_v42 = vmul.f32 %v629_v40, %v264_v41 }
 0x280   :  { %273 = vrot.lane.b32.xlu1 %v268_v42, %s758_s13 }
 0x2ee   :  { %v272_v43 = vpop.permute.xlu1 %271 }
 0x2ef   :  { %v277_v45 = vadd.f32 %v272_v43, %v152_v12 }
 0x2f2   :  { %v274_v44 = vpop.permute.xlu1 %273 }
 0x2f3   :  { %v278_v46 = vadd.f32 %v274_v44, %v155_v13 }
 0x2f5   :  { %v279_v47 = vpack.c.bf16 %v278_v46, %v277_v45 }
 0x2f7   :  { %581 = vmatmul.mubr.msk.bf16.vlgmr.msra.gmra.mrb[4].mxu0 %vm198_vm2, %v279_v47 }
 0x3ca   :  { %v358_v50 = vpop.f32.mrb[4].mxu0 }
 0x3cb   :  { %v359_v52 = vadd.f32 %v520_v48, %v358_v50  ;;  %v582_v53 = vpop.f32.mrb[5].mxu0 }
 0x3cc   :  { %v361_v54 = vpop.f32.mrb[6].mxu0 }
 0x3cd   :  { %v365_v55 = vmax.f32 %v359_v52, 0.0  ;;  %v362_v56 = vadd.f32 %v520_v48, %v361_v54  ;;  %v583_v57 = vpop.f32.mrb[7].mxu0  ;;  %v526_v62 = vmul.f32 -1.442695, %v359_v52 }
 0x3cf   :  { %v366_v59 = vmax.f32 %v362_v56, 0.0  ;;  %v379_v60 = vsub.f32 %v365_v55, %v277_v45  ;;  %v527_v63 = vmul.f32 -1.442695, %v362_v56  ;;  %630 = vpow2.f32 %v526_v62 }
 0x3d1   :  { %383 = vrot.lane.b32.xlu0 %v379_v60, %s758_s13  ;;  %v380_v61 = vsub.f32 %v366_v59, %v278_v46  ;;  %632 = vpow2.f32 %v527_v63 }
 0x3d3   :  { %385 = vrot.lane.b32.xlu1 %v380_v61, %s758_s13 }
 0x3d9   :  { %v631_v1 = vpop.eup %630 }
 0x3da   :  { %v373_v3 = vadd.f32 1.0, %v631_v1 }
 0x3db   :  { %v633_v2 = vpop.eup %632 }
 0x3dc   :  { %v374_v4 = vadd.f32 1.0, %v633_v2  ;;  %634 = vrcp.f32 %v373_v3 }
 0x3de   :  { %636 = vrcp.f32 %v374_v4 }
 0x3e6   :  { %v635_v6 = vpop.eup %634 }
 0x3e8   :  { %v637_v9 = vpop.eup %636 }
 0x443   :  { %v384_v7 = vpop.permute.xlu0 %383 }
 0x444   :  { %v389_v8 = vmul.f32 %v635_v6, %v384_v7 }
 0x445   :  { %v386_v10 = vpop.permute.xlu1 %385 }
 0x446   :  { %v390_v11 = vmul.f32 %v637_v9, %v386_v10  ;;  %393 = vrot.lane.b32.xlu0 %v389_v8, %s758_s13 }
 0x448   :  { %395 = vrot.lane.b32.xlu1 %v390_v11, %s758_s13  ;;  %s726_s13 = scalar_lea.vmem %s493_s9, 256 }
 0x449   :  { %p727_p4 = scmp.ne.s32.totalorder %s493_s9, %s726_s13  ;;  %p732_p6 = scmp.lt.s32.totalorder %s726_s13, %s726_s13 }
 0x44b   :  { %p733_p7 = por %p732_p6, %p731_p5 }
 0x44d   :  { %p734_p8 = pnand %p733_p7, %p727_p4 }
 0x4b8   :  { %v394_v0 = vpop.permute.xlu0 %393 }
 0x4b9   :  { %v399_v13 = vadd.f32 %v394_v0, %v277_v45 }
 0x4ba   :  { %v396_v12 = vpop.permute.xlu1 %395 }
 0x4bb   :  { %v400_v14 = vadd.f32 %v396_v12, %v278_v46 }
 0x4bd   :  { %v401_v15 = vpack.c.bf16 %v400_v14, %v399_v13 }
 0x4bf   :  { %593 = vmatmul.mubr.msk.bf16.vlgmr.msra.gmra.mrb[4].mxu1 %vm198_vm2, %v401_v15 }
 0x592   :  { %v478_v17 = vpop.f32.mrb[4].mxu1 }
 0x593   :  { %v479_v18 = vadd.f32 %v528_v16, %v478_v17  ;;  %v594_v19 = vpop.f32.mrb[5].mxu1 }
 0x594   :  { %v481_v20 = vpop.f32.mrb[6].mxu1 }
 0x595   :  { %485 = vst.msk [vmem:[#allocation10] sm:$0xff] %vm198_vm2, %v479_v18  ;;  %v482_v21 = vadd.f32 %v528_v16, %v481_v20  ;;  %v595_v22 = vpop.f32.mrb[7].mxu1 }
 0x597   :  { %486 = vst.msk [vmem:[#allocation10 + $0x8] sm:$0xff] %vm198_vm2, %v482_v21 }
 0x598   :  { %737 = shalt.err (!%p734_p8)
}
 0x599   :  { %s738_s11 = scalar_lea.hbm %s947_s7, 256 }
 0x59a   :  { %p739_p9 = scmp.ne.s32.totalorder %s947_s7, %s738_s11  ;;  %p742_p10 = scmp.lt.u32.totalorder %s738_s11, %s947_s7 }
 0x59c   :  { %p744_p11 = pnand %p742_p10, %p739_p9 }
 0x59e   :  { %747 = shalt.err (!%p744_p11)
}
 0x59f   :  { %s765_s27 = smov 128   ;;  %s766_s17 = smov 8  }
 0x5a0   :  { %498 = dma.vmem_to_hbm [thread:$0]  %s493_s9, 256, %s947_s7, [#allocation4], %s765_s27, %s765_s27, %s766_s17  }
 0x5a1   :  { %754 = dma.done.wait [#allocation4], 256  }
 0x5a2   :  { %755 = vsyncadd [#allocation4], 4294967040 }
 0x5a3   :  { %502 = vsyncpa [#allocation3], 1 }
 0x5a4   :  { %503 = vsyncpa [#allocation6], 1 }
 0x5a5   :  { %504 = vsyncpa [#allocation9], 1 }
 0x5a6   :  { %505 = vsyncpa [#allocation4], 1 }

</bundles_post_ra>
